<compile_context>
chip_gen: v7x
topology: tpu7x:2x2x1
jax: 0.10.0
libtpu: 0.0.40
codegen_flags: <defaults>
</compile_context>

<pallas_src>
import jax
import jax.numpy as jnp
from jax.experimental import pallas as pl
from jax.experimental.pallas import tpu as pltpu


def _round_up(n, m):
    return ((n + m - 1) // m) * m


def _fusion_plan(num_layers):
    """Static per-step plan for x = net[i//2](x) + net[i](x).

    Each step -> (linear_indices, n_relu):
      linear_indices: Linear-layer indices whose (W, b) are summed into a
                      single matmul (a repeated index means 2*(x@W+b)).
      n_relu:         how many of the two terms are ReLU(x).
    """
    plan = []
    for i in range(num_layers):
        lins = []
        n_relu = 0
        for idx in (i // 2, i):
            if idx % 2 == 0:          # even Sequential index -> Linear
                lins.append(idx // 2)
            else:                     # odd Sequential index -> ReLU
                n_relu += 1
        plan.append((tuple(lins), n_relu))
    return plan


def _prepare_fused(x, weights_t, biases):
    """Pad params, pre-sum the fused per-step weight/bias slabs (f32), cast W->bf16."""
    nlin, H_in, H_out = weights_t.shape
    assert H_in == H_out == x.shape[1], (
        "CustomNetwork.forward only type-checks with a uniform width"
    )
    H = H_in
    B = x.shape[0]
    num_layers = 2 * nlin - 1
    Hp = _round_up(H, 128)

    wp = jnp.pad(weights_t.astype(jnp.float32), ((0, 0), (0, Hp - H), (0, Hp - H)))
    bp = jnp.pad(biases.astype(jnp.float32), ((0, 0), (0, 0), (0, Hp - H)))

    slab_w, slab_b, plan = [], [], []
    for lins, n_relu in _fusion_plan(num_layers):
        if lins:
            W = wp[lins[0]]
            bvec = bp[lins[0]]
            for j in lins[1:]:
                W = W + wp[j]            # summed once per call (not per tile)
                bvec = bvec + bp[j]
            plan.append((len(slab_w), n_relu))
            slab_w.append(W)
            slab_b.append(bvec)
        else:
            plan.append((None, n_relu))

    fw = jnp.stack(slab_w).astype(jnp.bfloat16)   # (n_slabs, Hp, Hp) bf16 MXU feed
    fb = jnp.stack(slab_b)                        # (n_slabs, 1, Hp)  f32 bias
    return fw, fb, tuple(plan), (B, H, Hp, num_layers)


def _make_kernel(plan, Hp):
    def kernel(fw_ref, fb_ref, x_ref, out_ref):
        # fw_ref:  (n_slabs, Hp, Hp) bf16   pre-fused weights (in, out)
        # fb_ref:  (n_slabs, 1, Hp)  f32    pre-fused biases
        # x_ref:   (tb, Hp)          f32    one batch tile of the input
        # out_ref: (tb, num_layers*Hp) f32  all step outputs, layer-flattened
        x = x_ref[...]

        # Static unroll: num_layers is small, giving the LLO scheduler full
        # visibility.
        # TODO(synk): for deep nets move the slab index to a grid axis /
        # lax.fori_loop and stream one weight slab per step (needed anyway once
        # 2*n_slabs*Hp^2 bf16 no longer fits v7x's 64 MiB VMEM).
        for i, (slab, n_relu) in enumerate(plan):
            if slab is not None:
                lin = jnp.dot(x.astype(jnp.bfloat16), fw_ref[slab],
                              preferred_element_type=jnp.float32)
                lin = lin + fb_ref[slab]
            else:
                lin = None

            if n_relu == 2:
                r = jnp.maximum(x, 0.0)
                act = r + r
            elif n_relu == 1:
                act = jnp.maximum(x, 0.0)
            else:
                act = None

            if lin is None:
                x = act
            elif act is None:
                x = lin
            else:
                x = lin + act

            # Static, 128-aligned lane offset -> unmasked lane-dense store.
            # TODO(synk): emit bf16 activations here if the consumer tolerates
            # it (halves the dominant HBM writeback).
            out_ref[:, i * Hp:(i + 1) * Hp] = x

    return kernel


def custom_network_forward(x, weights_t, biases):
    """Full CustomNetwork forward as one batch-tiled pallas_call.

    Returns (num_layers, B, H): every intermediate activation, matching the
    PyTorch forward's `activations` list stacked on axis 0.
    """
    fw, fb, plan, (B, H, Hp, num_layers) = _prepare_fused(x, weights_t, biases)
    n_slabs = fw.shape[0]
    fw_bytes = fw.size * 2
    fb_bytes = fb.size * 4

    # Physical VMEM cap (per TensorCore) minus headroom for compiler internals.
    try:
        vmem_cap = int(pltpu.get_tpu_info().vmem_capacity_bytes)
    except Exception:
        vmem_cap = 64 << 20            # conservative: v7x per-TC VMEM
    cap = vmem_cap - (8 << 20)

    def _resident_bytes(tb_):
        # BlockSpec double-buffers every operand (constant-index weight blocks
        # are not re-DMA'd but still hold a second buffer).
        # TODO(synk): single-buffer the constant weight/bias blocks
        # (pl.Buffered(1) or ANY + one scratch copy) once its interaction with
        # megacore "parallel" grids is settled.
        return (2 * (fw_bytes + fb_bytes)
                + 2 * tb_ * Hp * 4
                + 2 * tb_ * num_layers * Hp * 4)

    # Batch tile: 256 rows fills the 2x256^2 MXU on v6e/v7x; shrink to fit VMEM.
    tb = min(_round_up(B, 8), 256)
    while tb > 8 and _resident_bytes(tb) > cap:
        tb = max(8, _round_up(tb // 2, 8))
    # v7x megacore: give the "parallel" batch axis >= 2 grid steps when the
    # batch allows, so both TensorCores get work.
    if _round_up(B, tb) == tb and tb > 8:
        tb = max(8, _round_up(tb // 2, 8))
    Bp = _round_up(B, tb)
    grid = (Bp // tb,)

    xp = jnp.pad(x.astype(jnp.float32), ((0, Bp - B), (0, Hp - H)))

    # Always set an explicit limit (>= v6e/v7x default 32 MiB, never above
    # physical).  Covers v5e's 16 MiB default scoped limit for mid-sized H.
    vmem_limit = int(min(max(_resident_bytes(tb) + (4 << 20), 32 << 20), cap))

    n_mm = sum(1 for s, _ in plan if s is not None)
    cost = pl.CostEstimate(
        flops=int(2 * n_mm * Bp * Hp * Hp),
        transcendentals=0,
        bytes_accessed=int(fw_bytes + fb_bytes + Bp * Hp * 4
                           + Bp * num_layers * Hp * 4),
    )

    out = pl.pallas_call(
        _make_kernel(plan, Hp),
        out_shape=jax.ShapeDtypeStruct((Bp, num_layers * Hp), jnp.float32),
        grid=grid,
        in_specs=[
            pl.BlockSpec((n_slabs, Hp, Hp), lambda g: (0, 0, 0)),  # fused W (VMEM-resident)
            pl.BlockSpec((n_slabs, 1, Hp), lambda g: (0, 0, 0)),   # fused b (VMEM-resident)
            pl.BlockSpec((tb, Hp), lambda g: (g, 0)),              # x batch tile
        ],
        # Batch-major, layer-flattened output: each grid step writes one
        # contiguous tb x (num_layers*Hp) HBM region.
        out_specs=pl.BlockSpec((tb, num_layers * Hp), lambda g: (g, 0)),
        compiler_params=pltpu.CompilerParams(
            dimension_semantics=("parallel",),   # batch axis -> both TCs on v7x
            vmem_limit_bytes=vmem_limit,
        ),
        cost_estimate=cost,
    )(fw, fb, xp)

    acts = out.reshape(Bp, num_layers, Hp)[:B, :, :H]
    return jnp.transpose(acts, (1, 0, 2))        # (num_layers, B, H)


def init_params(key, net_arch, obs_space, action_space):
    """Deterministic PyTorch-style (Kaiming-uniform-ish) Linear init."""
    dims = [obs_space] + list(net_arch) + [action_space]
    assert len(set(dims)) == 1, (
        "CustomNetwork.forward only works when all widths are equal"
    )
    H = dims[0]
    nlin = len(dims) - 1              # number of Linear layers
    keys = jax.random.split(key, 2 * nlin)
    bound = 1.0 / float(H) ** 0.5
    w_list, b_list = [], []
    for j in range(nlin):
        w_pt = jax.random.uniform(keys[2 * j], (H, H), jnp.float32, -bound, bound)
        b_pt = jax.random.uniform(keys[2 * j + 1], (H,), jnp.float32, -bound, bound)
        w_list.append(w_pt.T)              # store as (in, out): y = x @ W + b
        b_list.append(b_pt.reshape(1, H))
    return jnp.stack(w_list), jnp.stack(b_list)


def reference_forward(x, weights_t, biases):
    """Pure-f32 JAX reference mirroring the PyTorch forward loop (no fusion)."""
    nlin = weights_t.shape[0]
    num_layers = 2 * nlin - 1

    def apply(idx, v):
        if idx % 2 == 0:
            j = idx // 2
            return v @ weights_t[j] + biases[j]
        return jnp.maximum(v, 0.0)

    acts = []
    for i in range(num_layers):
        x = apply(i // 2, x) + apply(i, x)
        acts.append(x)
    return jnp.stack(acts)


def fused_bf16_reference(x, weights_t, biases):
    """Pure-JAX reference with the SAME fusion + bf16 matmul feed as the kernel."""
    fw, fb, plan, (B, H, Hp, num_layers) = _prepare_fused(x, weights_t, biases)
    v = jnp.pad(x.astype(jnp.float32), ((0, 0), (0, Hp - H)))
    outs = []
    for slab, n_relu in plan:
        terms = []
        if slab is not None:
            terms.append(jnp.dot(v.astype(jnp.bfloat16), fw[slab],
                                 preferred_element_type=jnp.float32) + fb[slab])
        if n_relu:
            r = jnp.maximum(v, 0.0)
            terms.append(r + r if n_relu == 2 else r)
        v = terms[0] if len(terms) == 1 else terms[0] + terms[1]
        outs.append(v[:, :H])
    return jnp.stack(outs)


if __name__ == "__main__":
    # Small shapes consistent with the module: batch=2, uniform width H=32,
    # net_arch=[32, 32] -> Sequential of 5 layers (3 Linear + 2 ReLU),
    # forward returns 5 activations.
    B, H = 2, 32
    net_arch = [H, H]
    obs_space = H
    action_space = H

    key = jax.random.PRNGKey(0)
    k_params, k_x = jax.random.split(key)
    weights_t, biases = init_params(k_params, net_arch, obs_space, action_space)
    x = jax.random.normal(k_x, (B, obs_space), dtype=jnp.float32)

    acts = custom_network_forward(x, weights_t, biases)
    acts = jax.block_until_ready(acts)
    assert acts.shape == (2 * len(net_arch) + 1, B, H), acts.shape

    # Tight check against a reference that mirrors the kernel's exact math
    # (fused slabs, bf16 MXU operands, f32 accumulation).
    mirror = fused_bf16_reference(x, weights_t, biases)
    assert jnp.allclose(acts, mirror, atol=2e-3, rtol=2e-3)

    # Looser check against the pure-f32 PyTorch-semantics forward (difference
    # is only the bf16 quantization of the matmul operands).
    ref = reference_forward(x, weights_t, biases)
    assert jnp.allclose(acts, ref, atol=1e-1, rtol=1e-1)

    print("KERNEL_OK")
</pallas_src>

<mosaic_0001>
module attributes {stable_mosaic.version = 11 : i64} {
  func.func @kernel(%arg0: i32, %arg1: memref<4x128x128xbf16, #tpu.memory_space<vmem>>, %arg2: memref<4x1x128xf32, #tpu.memory_space<vmem>>, %arg3: memref<8x128xf32, #tpu.memory_space<vmem>>, %arg4: memref<8x640xf32, #tpu.memory_space<vmem>>) attributes {dimension_semantics = [#tpu.dimension_semantics<parallel>], iteration_bounds = array<i64: 1>, scalar_prefetch = 0 : i64, scratch_operands = 0 : i64, tpu.core_type = #tpu.core_type<tc>, window_params = [{pipeline_mode = #tpu.pipeline_mode<synchronous>, transform_indices = @transform_0, window_bounds = array<i64: 4, 128, 128>}, {pipeline_mode = #tpu.pipeline_mode<synchronous>, transform_indices = @transform_1, window_bounds = array<i64: 4, 1, 128>}, {transform_indices = @transform_2, window_bounds = array<i64: 8, 128>}, {transform_indices = @transform_3, window_bounds = array<i64: 8, 640>}]} {
    %c0 = arith.constant 0 : index
    %c0_0 = arith.constant 0 : index
    %0 = vector.load %arg3[%c0, %c0_0] : memref<8x128xf32, #tpu.memory_space<vmem>>, vector<8x128xf32>
    %1 = arith.truncf %0 : vector<8x128xf32> to vector<8x128xbf16>
    %c0_1 = arith.constant 0 : index
    %c0_2 = arith.constant 0 : index
    %c0_3 = arith.constant 0 : index
    %2 = vector.load %arg1[%c0_1, %c0_2, %c0_3] : memref<4x128x128xbf16, #tpu.memory_space<vmem>>, vector<1x128x128xbf16>
    %3 = vector.shape_cast %2 : vector<1x128x128xbf16> to vector<128x128xbf16>
    %cst = arith.constant dense<0.000000e+00> : vector<8x128xf32>
    %4 = tpu.matmul %1, %3, %cst {dimension_numbers = #tpu.dot_dimension_numbers<[1], [0], [0], [1], [0, 0, 1, 1], [], []>} : vector<8x128xbf16>, vector<128x128xbf16>, vector<8x128xf32> -> vector<8x128xf32>
    %c0_4 = arith.constant 0 : index
    %c0_5 = arith.constant 0 : index
    %c0_6 = arith.constant 0 : index
    %5 = vector.load %arg2[%c0_4, %c0_5, %c0_6] : memref<4x1x128xf32, #tpu.memory_space<vmem>>, vector<1x1x128xf32>
    %6 = vector.shape_cast %5 : vector<1x1x128xf32> to vector<1x128xf32>
    %7 = vector.broadcast %6 : vector<1x128xf32> to vector<8x128xf32>
    %8 = arith.addf %4, %7 : vector<8x128xf32>
    %c0_7 = arith.constant 0 : index
    %c0_8 = arith.constant 0 : index
    %9 = vector.load %arg4[%c0_7, %c0_8] : memref<8x640xf32, #tpu.memory_space<vmem>>, vector<8x128xf32>
    tpu.vector_store %arg4[%c0_7, %c0_8], %8 {strides = array<i32>} : memref<8x640xf32, #tpu.memory_space<vmem>>, vector<8x128xf32>,
    %10 = arith.truncf %8 : vector<8x128xf32> to vector<8x128xbf16>
    %c1 = arith.constant 1 : index
    %c0_9 = arith.constant 0 : index
    %c0_10 = arith.constant 0 : index
    %11 = vector.load %arg1[%c1, %c0_9, %c0_10] : memref<4x128x128xbf16, #tpu.memory_space<vmem>>, vector<1x128x128xbf16>
    %12 = vector.shape_cast %11 : vector<1x128x128xbf16> to vector<128x128xbf16>
    %cst_11 = arith.constant dense<0.000000e+00> : vector<8x128xf32>
    %13 = tpu.matmul %10, %12, %cst_11 {dimension_numbers = #tpu.dot_dimension_numbers<[1], [0], [0], [1], [0, 0, 1, 1], [], []>} : vector<8x128xbf16>, vector<128x128xbf16>, vector<8x128xf32> -> vector<8x128xf32>
    %c1_12 = arith.constant 1 : index
    %c0_13 = arith.constant 0 : index
    %c0_14 = arith.constant 0 : index
    %14 = vector.load %arg2[%c1_12, %c0_13, %c0_14] : memref<4x1x128xf32, #tpu.memory_space<vmem>>, vector<1x1x128xf32>
    %15 = vector.shape_cast %14 : vector<1x1x128xf32> to vector<1x128xf32>
    %16 = vector.broadcast %15 : vector<1x128xf32> to vector<8x128xf32>
    %17 = arith.addf %13, %16 : vector<8x128xf32>
    %cst_15 = arith.constant 0.000000e+00 : f32
    %18 = vector.broadcast %cst_15 : f32 to vector<8x128xf32>
    %19 = arith.maximumf %8, %18 : vector<8x128xf32>
    %20 = arith.addf %17, %19 : vector<8x128xf32>
    %c0_16 = arith.constant 0 : index
    %c128 = arith.constant 128 : index
    %21 = vector.load %arg4[%c0_16, %c128] : memref<8x640xf32, #tpu.memory_space<vmem>>, vector<8x128xf32>
    tpu.vector_store %arg4[%c0_16, %c128], %20 {strides = array<i32>} : memref<8x640xf32, #tpu.memory_space<vmem>>, vector<8x128xf32>,
    %22 = arith.truncf %20 : vector<8x128xf32> to vector<8x128xbf16>
    %c2 = arith.constant 2 : index
    %c0_17 = arith.constant 0 : index
    %c0_18 = arith.constant 0 : index
    %23 = vector.load %arg1[%c2, %c0_17, %c0_18] : memref<4x128x128xbf16, #tpu.memory_space<vmem>>, vector<1x128x128xbf16>
    %24 = vector.shape_cast %23 : vector<1x128x128xbf16> to vector<128x128xbf16>
    %cst_19 = arith.constant dense<0.000000e+00> : vector<8x128xf32>
    %25 = tpu.matmul %22, %24, %cst_19 {dimension_numbers = #tpu.dot_dimension_numbers<[1], [0], [0], [1], [0, 0, 1, 1], [], []>} : vector<8x128xbf16>, vector<128x128xbf16>, vector<8x128xf32> -> vector<8x128xf32>
    %c2_20 = arith.constant 2 : index
    %c0_21 = arith.constant 0 : index
    %c0_22 = arith.constant 0 : index
    %26 = vector.load %arg2[%c2_20, %c0_21, %c0_22] : memref<4x1x128xf32, #tpu.memory_space<vmem>>, vector<1x1x128xf32>
    %27 = vector.shape_cast %26 : vector<1x1x128xf32> to vector<1x128xf32>
    %28 = vector.broadcast %27 : vector<1x128xf32> to vector<8x128xf32>
    %29 = arith.addf %25, %28 : vector<8x128xf32>
    %cst_23 = arith.constant 0.000000e+00 : f32
    %30 = vector.broadcast %cst_23 : f32 to vector<8x128xf32>
    %31 = arith.maximumf %20, %30 : vector<8x128xf32>
    %32 = arith.addf %29, %31 : vector<8x128xf32>
    %c0_24 = arith.constant 0 : index
    %c256 = arith.constant 256 : index
    %33 = vector.load %arg4[%c0_24, %c256] : memref<8x640xf32, #tpu.memory_space<vmem>>, vector<8x128xf32>
    tpu.vector_store %arg4[%c0_24, %c256], %32 {strides = array<i32>} : memref<8x640xf32, #tpu.memory_space<vmem>>, vector<8x128xf32>,
    %cst_25 = arith.constant 0.000000e+00 : f32
    %34 = vector.broadcast %cst_25 : f32 to vector<8x128xf32>
    %35 = arith.maximumf %32, %34 : vector<8x128xf32>
    %36 = arith.addf %35, %35 : vector<8x128xf32>
    %c0_26 = arith.constant 0 : index
    %c384 = arith.constant 384 : index
    %37 = vector.load %arg4[%c0_26, %c384] : memref<8x640xf32, #tpu.memory_space<vmem>>, vector<8x128xf32>
    tpu.vector_store %arg4[%c0_26, %c384], %36 {strides = array<i32>} : memref<8x640xf32, #tpu.memory_space<vmem>>, vector<8x128xf32>,
    %38 = arith.truncf %36 : vector<8x128xf32> to vector<8x128xbf16>
    %c3 = arith.constant 3 : index
    %c0_27 = arith.constant 0 : index
    %c0_28 = arith.constant 0 : index
    %39 = vector.load %arg1[%c3, %c0_27, %c0_28] : memref<4x128x128xbf16, #tpu.memory_space<vmem>>, vector<1x128x128xbf16>
    %40 = vector.shape_cast %39 : vector<1x128x128xbf16> to vector<128x128xbf16>
    %cst_29 = arith.constant dense<0.000000e+00> : vector<8x128xf32>
    %41 = tpu.matmul %38, %40, %cst_29 {dimension_numbers = #tpu.dot_dimension_numbers<[1], [0], [0], [1], [0, 0, 1, 1], [], []>} : vector<8x128xbf16>, vector<128x128xbf16>, vector<8x128xf32> -> vector<8x128xf32>
    %c3_30 = arith.constant 3 : index
    %c0_31 = arith.constant 0 : index
    %c0_32 = arith.constant 0 : index
    %42 = vector.load %arg2[%c3_30, %c0_31, %c0_32] : memref<4x1x128xf32, #tpu.memory_space<vmem>>, vector<1x1x128xf32>
    %43 = vector.shape_cast %42 : vector<1x1x128xf32> to vector<1x128xf32>
    %44 = vector.broadcast %43 : vector<1x128xf32> to vector<8x128xf32>
    %45 = arith.addf %41, %44 : vector<8x128xf32>
    %c0_33 = arith.constant 0 : index
    %c512 = arith.constant 512 : index
    %46 = vector.load %arg4[%c0_33, %c512] : memref<8x640xf32, #tpu.memory_space<vmem>>, vector<8x128xf32>
    tpu.vector_store %arg4[%c0_33, %c512], %45 {strides = array<i32>} : memref<8x640xf32, #tpu.memory_space<vmem>>, vector<8x128xf32>,
    return
  }
  func.func @transform_0(%arg0: i32) -> (i32, i32, i32) {
    %c0_i32 = arith.constant 0 : i32
    %c0_i32_0 = arith.constant 0 : i32
    %c0_i32_1 = arith.constant 0 : i32
    %c0_i32_2 = arith.constant 0 : i32
    return %c0_i32, %c0_i32_0, %c0_i32_1 : i32, i32, i32
  }
  func.func @transform_1(%arg0: i32) -> (i32, i32, i32) {
    %c0_i32 = arith.constant 0 : i32
    %c0_i32_0 = arith.constant 0 : i32
    %c0_i32_1 = arith.constant 0 : i32
    %c0_i32_2 = arith.constant 0 : i32
    return %c0_i32, %c0_i32_0, %c0_i32_1 : i32, i32, i32
  }
  func.func @transform_2(%arg0: i32) -> (i32, i32) {
    %c0_i32 = arith.constant 0 : i32
    %c0_i32_0 = arith.constant 0 : i32
    return %arg0, %c0_i32 : i32, i32
  }
  func.func @transform_3(%arg0: i32) -> (i32, i32) {
    %c0_i32 = arith.constant 0 : i32
    %c0_i32_0 = arith.constant 0 : i32
    return %arg0, %c0_i32 : i32, i32
  }
}

</mosaic_0001>

<bundles_post_ra>
// kernel: tpu_custom_call.1
= control target key start
LH: loop header
LB: loop body
LE: loop exit
PB: predicated region body
PF: predicated region fallthrough
CT: control target
= control target key end

     0   :  { %8 = vsyncpa [#allocation3], 0  ;;  %s943_s0 = inlined_call_operand.hbm [shape: bf16[4,128,128], index: 0, kind: input, shape index: {}]   ;;  %s944_s1 = inlined_call_operand.hbm [shape: f32[4,1,128], index: 1, kind: input, shape index: {}]   ;;  %s945_s2 = inlined_call_operand.hbm [shape: f32[8,128], index: 2, kind: input, shape index: {}]   ;;  %s946_s3 = inlined_call_operand.hbm [shape: f32[8,640], index: 3, kind: output, shape index: {}]  }
   0x1   :  { %9 = vsyncpa [#allocation6], 0 }
   0x2   :  { %10 = vsyncpa [#allocation4], 0  ;;  %s825_s12 = smov [#allocation5]   ;;  %s731_s16 = scalar_lea.hbm %s944_s1, 64 }
   0x3   :  { %s28_s13 = sshll.u32 %s825_s12, 4  ;;  %p732_p0 = scmp.ne.s32.totalorder %s944_s1, %s731_s16  ;;  %s29_s13 = int_to_ptr.vmem [resolvable:$true] %s28_s13 }
   0x4   :  { %p735_p1 = scmp.lt.u32.totalorder %s731_s16, %s944_s1 }
   0x6   :  { %p737_p2 = pnand %p735_p1, %p732_p0 }
   0x8   :  { %740 = shalt.err (!%p737_p2)
}
   0x9   :  { %s741_s21 = scalar_lea.vmem %s29_s13, 64  ;;  %p746_p4 = scmp.lt.s32.totalorder %s29_s13, %s29_s13 }
   0xa   :  { %p742_p3 = scmp.ne.s32.totalorder %s29_s13, %s741_s21  ;;  %p747_p5 = scmp.lt.s32.totalorder %s741_s21, %s741_s21 }
   0xc   :  { %p748_p6 = por %p747_p5, %p746_p4 }
   0xe   :  { %p749_p7 = pnand %p748_p6, %p742_p3 }
  0x10   :  { %752 = shalt.err (!%p749_p7)
}
  0x11   :  { %s826_s22 = smov 16   ;;  %s827_s23 = smov 1  }
  0x12   :  { %34 = dma.hbm_to_vmem [thread:$0]  %s944_s1, 64, %s29_s13, [#allocation6], %s826_s22, %s826_s22, %s827_s23  }
  0x13   :  { %s828_s26 = smov [#allocation2]   ;;  %s753_s30 = scalar_lea.hbm %s943_s0, 4096 }
  0x14   :  { %s16_s27 = sshll.u32 %s828_s26, 4  ;;  %p754_p8 = scmp.ne.s32.totalorder %s943_s0, %s753_s30  ;;  %s17_s27 = int_to_ptr.vmem [resolvable:$true] %s16_s27 }
  0x15   :  { %p757_p9 = scmp.lt.u32.totalorder %s753_s30, %s943_s0 }
  0x17   :  { %p759_p10 = pnand %p757_p9, %p754_p8 }
  0x19   :  { %762 = shalt.err (!%p759_p10)
}
  0x1a   :  { %s763_s8 = scalar_lea.vmem %s17_s27, 4096  ;;  %p768_p12 = scmp.lt.s32.totalorder %s17_s27, %s17_s27 }
  0x1b   :  { %p764_p11 = scmp.ne.s32.totalorder %s17_s27, %s763_s8  ;;  %p769_p13 = scmp.lt.s32.totalorder %s763_s8, %s763_s8 }
  0x1d   :  { %p770_p0 = por %p769_p13, %p768_p12 }
  0x1f   :  { %p771_p1 = pnand %p770_p0, %p764_p11 }
  0x21   :  { %774 = shalt.err (!%p771_p1)
}
  0x22   :  { %s829_s1 = smov 64   ;;  %s830_s9 = smov 4  }
  0x23   :  { %22 = dma.hbm_to_vmem [thread:$0]  %s943_s0, 4096, %s17_s27, [#allocation3], %s829_s1, %s829_s1, %s830_s9  }
  0x24   :  { %s831_s12 = smov [#allocation7]   ;;  %s775_s16 = scalar_lea.hbm %s945_s2, 128 }
  0x25   :  { %s41_s13 = sshll.u32 %s831_s12, 4  ;;  %p776_p2 = scmp.ne.s32.totalorder %s945_s2, %s775_s16  ;;  %s42_s13 = int_to_ptr.vmem [resolvable:$true] %s41_s13 }
  0x26   :  { %p779_p3 = scmp.lt.u32.totalorder %s775_s16, %s945_s2 }
  0x28   :  { %p781_p4 = pnand %p779_p3, %p776_p2 }
  0x2a   :  { %784 = shalt.err (!%p781_p4)
}
  0x2b   :  { %s785_s21 = scalar_lea.vmem %s42_s13, 128  ;;  %p790_p6 = scmp.lt.s32.totalorder %s42_s13, %s42_s13 }
  0x2c   :  { %p786_p5 = scmp.ne.s32.totalorder %s42_s13, %s785_s21  ;;  %p791_p7 = scmp.lt.s32.totalorder %s785_s21, %s785_s21 }
  0x2e   :  { %p792_p8 = por %p791_p7, %p790_p6 }
  0x30   :  { %p793_p9 = pnand %p792_p8, %p786_p5 }
  0x32   :  { %796 = shalt.err (!%p793_p9)
}
  0x33   :  { %44 = dma.hbm_to_vmem [thread:$0]  %s945_s2, 128, %s42_s13, [#allocation6]  }
  0x34   :  { %819 = dma.done.wait [#allocation3], 4096  }
  0x35   :  { %820 = vsyncadd [#allocation3], 4294963200 }
  0x36   :  { %821 = dma.done.wait [#allocation6], 192  }
  0x37   :  { %822 = vsyncadd [#allocation6], 4294967104  ;;  %v832_v0 = vmov 0.0   ;;  %vm833_vm0 = vmmov 0   ;;  %v699_v1 = vld [vmem:[#allocation2] sm:$0xff]   ;;  %v700_v2 = vld [vmem:[#allocation2 + $0x8] sm:$0xff]  }
  0x38   :  { %609 = vmatprep.subr.bf16.mxu0 %v832_v0  ;;  %625 = vmatprep.mubr.msk.bf16.mxu0 %vm833_vm0, %v832_v0  ;;  %v701_v3 = vld [vmem:[#allocation2 + $0x10] sm:$0xff]   ;;  %v707_v4 = vld [vmem:[#allocation2 + $0x40] sm:$0xff]   ;;  %v702_v5 = vld [vmem:[#allocation2 + $0x18] sm:$0xff]   ;;  %s834_s2 = smov [#allocation8]  }
  0x39   :  { %629 = vmatprep.subr.bf16.mxu1 %v832_v0  ;;  %645 = vmatprep.mubr.msk.bf16.mxu1 %vm833_vm0, %v832_v0  ;;  %v708_v6 = vld [vmem:[#allocation2 + $0x48] sm:$0xff]   ;;  %v703_v7 = vld [vmem:[#allocation2 + $0x20] sm:$0xff]   ;;  %v709_v8 = vld [vmem:[#allocation2 + $0x50] sm:$0xff]   ;;  %s527_s23 = sshll.u32 %s834_s2, 4  ;;  %s528_s23 = int_to_ptr.vmem [resolvable:$true] %s527_s23 }
  0x3a   :  { %610 = vmatpush3.bf16.msra.mxu0 %v699_v1  ;;  %630 = vmatpush3.bf16.msra.mxu1 %v707_v4  ;;  %v704_v9 = vld [vmem:[#allocation2 + $0x28] sm:$0xff]   ;;  %v710_v10 = vld [vmem:[#allocation2 + $0x58] sm:$0xff]   ;;  %v705_v11 = vld [vmem:[#allocation2 + $0x30] sm:$0xff]   ;;  %s797_s24 = scalar_lea.vmem %s528_s23, 640  ;;  %p802_p11 = scmp.lt.s32.totalorder %s528_s23, %s528_s23 }
  0x3b   :  { %611 = vmatprep.subr.bf16.mxu0 %v832_v0  ;;  %631 = vmatprep.subr.bf16.mxu1 %v832_v0  ;;  %v711_v12 = vld [vmem:[#allocation2 + $0x60] sm:$0xff]   ;;  %v706_v13 = vld [vmem:[#allocation2 + $0x38] sm:$0xff]   ;;  %v712_v15 = vld [vmem:[#allocation2 + $0x68] sm:$0xff]   ;;  %p798_p10 = scmp.ne.s32.totalorder %s528_s23, %s797_s24  ;;  %p803_p12 = scmp.lt.s32.totalorder %s797_s24, %s797_s24 }
  0x3c   :  { %v55_v14 = vld [vmem:[#allocation7] sm:$0xff]  ;;  %v713_v17 = vld [vmem:[#allocation2 + $0x70] sm:$0xff]   ;;  %v714_v18 = vld [vmem:[#allocation2 + $0x78] sm:$0xff]  }
  0x3d   :  { %v56_v16 = vpack.c.bf16 %v55_v14, %v55_v14  ;;  %v715_v19 = vld [vmem:[#allocation2 + $0x80] sm:$0xff]   ;;  %v716_v20 = vld [vmem:[#allocation2 + $0x88] sm:$0xff]   ;;  %v717_v21 = vld [vmem:[#allocation2 + $0x90] sm:$0xff]   ;;  %p804_p13 = por %p803_p12, %p802_p11 }
  0x3e   :  { %612 = vmatpush3.bf16.msra.mxu0 %v700_v2  ;;  %632 = vmatpush3.bf16.msra.mxu1 %v708_v6  ;;  %v718_v22 = vld [vmem:[#allocation2 + $0x98] sm:$0xff]   ;;  %v719_v23 = vld [vmem:[#allocation2 + $0xa0] sm:$0xff]   ;;  %v720_v24 = vld [vmem:[#allocation2 + $0xa8] sm:$0xff]  }
  0x3f   :  { %613 = vmatprep.subr.bf16.mxu0 %v832_v0  ;;  %633 = vmatprep.subr.bf16.mxu1 %v832_v0  ;;  %v537_v25 = vld [vmem:[#allocation5] ss:$0 sm:$0xff]  ;;  %v721_v32 = vld [vmem:[#allocation2 + $0xb0] sm:$0xff]   ;;  %v722_v33 = vld [vmem:[#allocation2 + $0xb8] sm:$0xff]   ;;  %p805_p0 = pnand %p804_p13, %p798_p10 }
  0x40   :  { %v723_v34 = vld [vmem:[#allocation2 + $0xc0] sm:$0xff]   ;;  %v724_v35 = vld [vmem:[#allocation2 + $0xc8] sm:$0xff]   ;;  %v725_v36 = vld [vmem:[#allocation2 + $0xd0] sm:$0xff]  }
  0x41   :  { %v726_v37 = vld [vmem:[#allocation2 + $0xd8] sm:$0xff]   ;;  %v727_v38 = vld [vmem:[#allocation2 + $0xe0] sm:$0xff]   ;;  %v728_v48 = vld [vmem:[#allocation2 + $0xe8] sm:$0xff]  }
  0x42   :  { %614 = vmatpush3.bf16.msra.mxu0 %v701_v3  ;;  %634 = vmatpush3.bf16.msra.mxu1 %v709_v8  ;;  %v546_v39 = vld [vmem:[#allocation5 + $0x1] ss:$0 sm:$0xff]  ;;  %v729_v49 = vld [vmem:[#allocation2 + $0xf0] sm:$0xff]   ;;  %v730_v50 = vld [vmem:[#allocation2 + $0xf8] sm:$0xff]  }
  0x43   :  { %615 = vmatprep.subr.bf16.mxu0 %v832_v0  ;;  %635 = vmatprep.subr.bf16.mxu1 %v832_v0  ;;  %v555_v51 = vld [vmem:[#allocation5 + $0x2] ss:$0 sm:$0xff]  ;;  %v564_v62 = vld [vmem:[#allocation5 + $0x3] ss:$0 sm:$0xff] }
  0x46   :  { %616 = vmatpush3.bf16.msra.mxu0 %v702_v5  ;;  %636 = vmatpush3.bf16.msra.mxu1 %v710_v10 }
  0x47   :  { %617 = vmatprep.subr.bf16.mxu0 %v832_v0  ;;  %637 = vmatprep.subr.bf16.mxu1 %v832_v0 }
  0x4a   :  { %618 = vmatpush3.bf16.msra.mxu0 %v703_v7  ;;  %638 = vmatpush3.bf16.msra.mxu1 %v711_v12 }
  0x4b   :  { %619 = vmatprep.subr.bf16.mxu0 %v832_v0  ;;  %639 = vmatprep.subr.bf16.mxu1 %v832_v0 }
  0x4e   :  { %620 = vmatpush3.bf16.msra.mxu0 %v704_v9  ;;  %640 = vmatpush3.bf16.msra.mxu1 %v712_v15 }
  0x4f   :  { %621 = vmatprep.subr.bf16.mxu0 %v832_v0  ;;  %641 = vmatprep.subr.bf16.mxu1 %v832_v0 }
  0x52   :  { %622 = vmatpush3.bf16.msra.mxu0 %v705_v11  ;;  %642 = vmatpush3.bf16.msra.mxu1 %v713_v17 }
  0x53   :  { %623 = vmatprep.subr.bf16.mxu0 %v832_v0  ;;  %643 = vmatprep.subr.bf16.mxu1 %v832_v0 }
  0x56   :  { %624 = vmatpush3.bf16.msra.mxu0 %v706_v13  ;;  %644 = vmatpush3.bf16.msra.mxu1 %v714_v18 }
  0x57   :  { %649 = vmatprep.subr.bf16.mxu0 %v832_v0  ;;  %669 = vmatprep.subr.bf16.mxu1 %v832_v0 }
  0x59   :  { %626 = vmatmul.mubr.bf16.vlgmr.msra.gmra.mrb[0].mxu0 %v56_v16 }
  0x5a   :  { %665 = vmatprep.mubr.msk.bf16.mxu0 %vm833_vm0, %v832_v0  ;;  %650 = vmatpush3.bf16.msra.mxu0 %v715_v19 }
  0x5b   :  { %651 = vmatprep.subr.bf16.mxu0 %v832_v0 }
  0x5e   :  { %652 = vmatpush3.bf16.msra.mxu0 %v716_v20 }
  0x5f   :  { %653 = vmatprep.subr.bf16.mxu0 %v832_v0 }
  0x62   :  { %654 = vmatpush3.bf16.msra.mxu0 %v717_v21 }
  0x63   :  { %655 = vmatprep.subr.bf16.mxu0 %v832_v0 }
  0x66   :  { %656 = vmatpush3.bf16.msra.mxu0 %v718_v22 }
  0x67   :  { %657 = vmatprep.subr.bf16.mxu0 %v832_v0 }
  0x6a   :  { %658 = vmatpush3.bf16.msra.mxu0 %v719_v23 }
  0x6b   :  { %659 = vmatprep.subr.bf16.mxu0 %v832_v0 }
  0x6e   :  { %660 = vmatpush3.bf16.msra.mxu0 %v720_v24 }
  0x6f   :  { %661 = vmatprep.subr.bf16.mxu0 %v832_v0 }
  0x72   :  { %662 = vmatpush3.bf16.msra.mxu0 %v721_v32 }
  0x73   :  { %663 = vmatprep.subr.bf16.mxu0 %v832_v0 }
  0x76   :  { %664 = vmatpush3.bf16.msra.mxu0 %v722_v33 }
 0x12c   :  { %v162_v26 = vpop.f32.mrb[0].mxu0 }
 0x12d   :  { %v163_v27 = vadd.f32 %v537_v25, %v162_v26  ;;  %v627_v28 = vpop.f32.mrb[1].mxu0 }
 0x12e   :  { %v165_v29 = vpop.f32.mrb[2].mxu0 }
 0x12f   :  { %168 = vst [vmem:[#allocation8] sm:$0xff] %v163_v27  ;;  %v628_v30 = vpop.f32.mrb[3].mxu0  ;;  %v169_v31 = vpack.c.bf16 %v163_v27, %v163_v27  ;;  %v283_v42 = vmax.f32 %v163_v27, 0.0 }
 0x131   :  { %646 = vmatmul.mubr.bf16.vlgmr.msra.gmra.mrb[0].mxu1 %v169_v31 }
 0x132   :  { %685 = vmatprep.mubr.msk.bf16.mxu1 %vm833_vm0, %v832_v0  ;;  %670 = vmatpush3.bf16.msra.mxu1 %v723_v34 }
 0x133   :  { %671 = vmatprep.subr.bf16.mxu1 %v832_v0 }
 0x136   :  { %672 = vmatpush3.bf16.msra.mxu1 %v724_v35 }
 0x137   :  { %673 = vmatprep.subr.bf16.mxu1 %v832_v0 }
 0x13a   :  { %674 = vmatpush3.bf16.msra.mxu1 %v725_v36 }
 0x13b   :  { %675 = vmatprep.subr.bf16.mxu1 %v832_v0 }
 0x13e   :  { %676 = vmatpush3.bf16.msra.mxu1 %v726_v37 }
 0x13f   :  { %677 = vmatprep.subr.bf16.mxu1 %v832_v0 }
 0x142   :  { %678 = vmatpush3.bf16.msra.mxu1 %v727_v38 }
 0x143   :  { %679 = vmatprep.subr.bf16.mxu1 %v832_v0 }
 0x146   :  { %680 = vmatpush3.bf16.msra.mxu1 %v728_v48 }
 0x147   :  { %681 = vmatprep.subr.bf16.mxu1 %v832_v0 }
 0x14a   :  { %682 = vmatpush3.bf16.msra.mxu1 %v729_v49 }
 0x14b   :  { %683 = vmatprep.subr.bf16.mxu1 %v832_v0 }
 0x14e   :  { %684 = vmatpush3.bf16.msra.mxu1 %v730_v50 }
 0x204   :  { %v277_v40 = vpop.f32.mrb[0].mxu1 }
 0x205   :  { %v278_v41 = vadd.f32 %v546_v39, %v277_v40  ;;  %v647_v43 = vpop.f32.mrb[1].mxu1 }
 0x206   :  { %v280_v44 = vpop.f32.mrb[2].mxu1 }
 0x207   :  { %v284_v45 = vadd.f32 %v283_v42, %v278_v41  ;;  %v648_v46 = vpop.f32.mrb[3].mxu1 }
 0x209   :  { %285 = vst [vmem:[#allocation8 + $0x8] sm:$0xff] %v284_v45  ;;  %v286_v47 = vpack.c.bf16 %v284_v45, %v284_v45  ;;  %v400_v54 = vmax.f32 %v284_v45, 0.0 }
 0x20b   :  { %666 = vmatmul.mubr.bf16.vlgmr.msra.gmra.mrb[4].mxu0 %v286_v47 }
 0x2de   :  { %v394_v52 = vpop.f32.mrb[4].mxu0 }
 0x2df   :  { %v395_v53 = vadd.f32 %v555_v51, %v394_v52  ;;  %v667_v55 = vpop.f32.mrb[5].mxu0 }
 0x2e0   :  { %v397_v56 = vpop.f32.mrb[6].mxu0 }
 0x2e1   :  { %v401_v57 = vadd.f32 %v400_v54, %v395_v53  ;;  %v668_v58 = vpop.f32.mrb[7].mxu0 }
 0x2e3   :  { %402 = vst [vmem:[#allocation8 + $0x10] sm:$0xff] %v401_v57  ;;  %v403_v59 = vmax.f32 %v401_v57, 0.0 }
 0x2e5   :  { %v404_v60 = vadd.f32 %v403_v59, %v403_v59 }
 0x2e7   :  { %405 = vst [vmem:[#allocation8 + $0x18] sm:$0xff] %v404_v60  ;;  %v406_v61 = vpack.c.bf16 %v404_v60, %v404_v60 }
 0x2e9   :  { %686 = vmatmul.mubr.bf16.vlgmr.msra.gmra.mrb[4].mxu1 %v406_v61 }
 0x3bc   :  { %v514_v63 = vpop.f32.mrb[4].mxu1 }
 0x3bd   :  { %v515_v0 = vadd.f32 %v564_v62, %v514_v63  ;;  %v687_v1 = vpop.f32.mrb[5].mxu1 }
 0x3be   :  { %v517_v2 = vpop.f32.mrb[6].mxu1 }
 0x3bf   :  { %520 = vst [vmem:[#allocation8 + $0x20] sm:$0xff] %v515_v0  ;;  %v688_v3 = vpop.f32.mrb[7].mxu1 }
 0x3c0   :  { %808 = shalt.err (!%p805_p0)
}
 0x3c1   :  { %s809_s27 = scalar_lea.hbm %s946_s3, 640 }
 0x3c2   :  { %p810_p1 = scmp.ne.s32.totalorder %s946_s3, %s809_s27  ;;  %p813_p2 = scmp.lt.u32.totalorder %s809_s27, %s946_s3 }
 0x3c4   :  { %p815_p3 = pnand %p813_p2, %p810_p1 }
 0x3c6   :  { %818 = shalt.err (!%p815_p3)
}
 0x3c7   :  { %530 = dma.vmem_to_hbm [thread:$0]  %s528_s23, 640, %s946_s3, [#allocation4]  }
 0x3c8   :  { %823 = dma.done.wait [#allocation4], 640  }
 0x3c9   :  { %824 = vsyncadd [#allocation4], 4294966656 }
 0x3ca   :  { %534 = vsyncpa [#allocation3], 1 }
 0x3cb   :  { %535 = vsyncpa [#allocation6], 1 }
 0x3cc   :  { %536 = vsyncpa [#allocation4], 1 }

</bundles_post_ra>
